<compile_context>
chip_gen: v6e
topology: v6e:2x2x1
jax: 0.10.0
libtpu: 0.0.40
codegen_flags: <defaults>
</compile_context>

<pallas_src>
import functools

import jax
import jax.numpy as jnp
from jax.experimental import pallas as pl
from jax.experimental.pallas import tpu as pltpu


D = 512  # fixed by the module (Linear in/out features = 512)


def _attention_kernel(h_ref, projn_ref, wh_t_ref, w_row_ref, out_ref):
    """One block of B_TILE batch elements per grid step.

    h_ref     : (B_TILE, L, D)  f32   H tile
    projn_ref : (B_TILE, 1, D)  bf16  precomputed h_N @ WN^T
    wh_t_ref  : (D, D)          bf16  Wh^T (in, out), resident across steps
    w_row_ref : (1, D)          f32   w row vector
    out_ref   : (B_TILE, 1, D)  f32   result r
    """
    bt, L, Dd = h_ref.shape

    Hb = h_ref[...]                                           # (bt, L, D) f32

    # --- main projection: one flattened (bt*L, D) x (D, D) bf16 MXU matmul ---
    # L is a multiple of 8 here, so the reshape is layout-preserving.
    Hflat = Hb.reshape(bt * L, Dd).astype(jnp.bfloat16)
    proj_h = jnp.dot(Hflat, wh_t_ref[...],
                     preferred_element_type=jnp.float32)      # (bt*L, D) f32
    proj_h = proj_h.reshape(bt, L, Dd)

    # add the (hoisted) h_N projection, broadcast over L
    pre = proj_h + projn_ref[...].astype(jnp.float32)         # (bt, L, D)

    # penalized tanh: 0.75*relu(tanh(x)) + 0.25*tanh(x)
    t = jnp.tanh(pre)
    M = 0.75 * jnp.maximum(t, 0.0) + 0.25 * t                 # (bt, L, D)

    # scores = M @ w^T  (N=1)  ->  VPU multiply + lane reduce instead of MXU
    scores = jnp.sum(M * w_row_ref[...], axis=-1, keepdims=True)   # (bt, L, 1)

    # softmax over the last (size-1) axis — faithful to the PyTorch code
    mx = jnp.max(scores, axis=-1, keepdims=True)
    ex = jnp.exp(scores - mx)
    alpha = ex / jnp.sum(ex, axis=-1, keepdims=True)          # (bt, L, 1) == 1

    # r = alpha^T @ H  (M=1 matmul)  ->  VPU multiply + sublane reduce over L
    r = jnp.sum(alpha * Hb, axis=1, keepdims=True)            # (bt, 1, D) f32
    out_ref[...] = r.astype(out_ref.dtype)


def _choose_b_tile(B, L):
    """~256 flattened rows per grid step (fills a 256-wide MXU pass on
    v6e/v7x, 2x128 on v5e) while keeping >=2 grid steps so the "parallel"
    batch axis can shard across v7x's two TensorCores."""
    target = max(1, 256 // max(L, 1))
    bt = min(B, target)
    if B >= 2:
        bt = min(bt, max(1, B // 2))   # keep at least 2 grid steps
    while bt > 1 and B % bt != 0:      # clean blocking
        bt -= 1
    return max(bt, 1)


@functools.partial(jax.jit, static_argnames=("b_tile",))
def attention_pallas(H, h_N, Wh, WN, w, *, b_tile=None):
    """H: (B, L, D) f32, h_N: (B, 1, D) f32.
    Wh, WN: (D, D) torch-layout (out, in); w: (1, D) torch-layout."""
    B, L, Dd = H.shape
    assert Dd == D and h_N.shape == (B, 1, D)

    # --- plain-JAX glue (one-time, well-shaped) ---
    Wh_t = Wh.T.astype(jnp.bfloat16)                     # (D, D) (in, out), bf16 for MXU
    projN = (h_N @ WN.T).astype(jnp.bfloat16)            # (B, 1, D) hoisted WN projection
    w_row = w.astype(jnp.float32)                        # (1, D)

    if b_tile is None:
        b_tile = _choose_b_tile(B, L)
    assert B % b_tile == 0
    grid = (B // b_tile,)

    return pl.pallas_call(
        _attention_kernel,
        out_shape=jax.ShapeDtypeStruct((B, 1, D), jnp.float32),
        grid_spec=pltpu.PrefetchScalarGridSpec(
            num_scalar_prefetch=0,
            grid=grid,
            in_specs=[
                pl.BlockSpec((b_tile, L, D), lambda b: (b, 0, 0)),  # H (f32)
                pl.BlockSpec((b_tile, 1, D), lambda b: (b, 0, 0)),  # projN (bf16)
                pl.BlockSpec((D, D), lambda b: (0, 0)),             # Wh^T (bf16, resident)
                pl.BlockSpec((1, D), lambda b: (0, 0)),             # w row (f32)
            ],
            out_specs=pl.BlockSpec((b_tile, 1, D), lambda b: (b, 0, 0)),
        ),
        compiler_params=pltpu.CompilerParams(
            dimension_semantics=("parallel",),
        ),
    )(H, projN, Wh_t, w_row)


def attention_reference(H, h_N, Wh, WN, w):
    """Pure-JAX reference matching the PyTorch forward line by line."""
    B, L, _ = H.shape
    eN = jnp.ones((B, L, 1), jnp.float32)
    pre = H @ Wh.T + (eN * h_N) @ WN.T
    t = jnp.tanh(pre)
    M = 0.75 * jax.nn.relu(t) + 0.25 * t
    scores = M @ w.T                                   # (B, L, 1)
    alpha = jax.nn.softmax(scores, axis=-1)            # softmax over size-1 axis
    alpha = jnp.transpose(alpha, (0, 2, 1))            # (B, 1, L)
    return alpha @ H                                   # (B, 1, D)


if __name__ == "__main__":
    B, L = 2, 8  # small batch / sequence; feature dim fixed at 512 by the module

    key = jax.random.PRNGKey(0)
    k_h, k_hn, k_wh, k_wn, k_w = jax.random.split(key, 5)

    H = jax.random.normal(k_h, (B, L, D), dtype=jnp.float32)
    h_N = jax.random.normal(k_hn, (B, 1, D), dtype=jnp.float32)

    # Deterministic synthetic weights (torch Linear layout: (out, in)).
    scale = 1.0 / jnp.sqrt(jnp.float32(D))
    Wh = jax.random.normal(k_wh, (D, D), dtype=jnp.float32) * scale
    WN = jax.random.normal(k_wn, (D, D), dtype=jnp.float32) * scale
    w = jax.random.normal(k_w, (1, D), dtype=jnp.float32) * scale

    out = attention_pallas(H, h_N, Wh, WN, w)
    out = jax.block_until_ready(out)

    ref = attention_reference(H, h_N, Wh, WN, w)
    assert out.shape == (B, 1, D)
    assert jnp.allclose(out, ref, atol=1e-4, rtol=1e-4), "mismatch vs reference"

    print("KERNEL_OK")
</pallas_src>

<mosaic_0001>
module attributes {stable_mosaic.version = 11 : i64} {
  func.func @_attention_kernel(%arg0: i32, %arg1: memref<1x8x512xf32, #tpu.memory_space<vmem>>, %arg2: memref<1x1x512xbf16, #tpu.memory_space<vmem>>, %arg3: memref<512x512xbf16, #tpu.memory_space<vmem>>, %arg4: memref<1x512xf32, #tpu.memory_space<vmem>>, %arg5: memref<1x1x512xf32, #tpu.memory_space<vmem>>) attributes {dimension_semantics = [#tpu.dimension_semantics<parallel>], iteration_bounds = array<i64: 2>, scalar_prefetch = 0 : i64, scratch_operands = 0 : i64, tpu.core_type = #tpu.core_type<tc>, window_params = [{transform_indices = @transform_0, window_bounds = array<i64: 1, 8, 512>}, {transform_indices = @transform_1, window_bounds = array<i64: 1, 1, 512>}, {pipeline_mode = #tpu.pipeline_mode<synchronous>, transform_indices = @transform_2, window_bounds = array<i64: 512, 512>}, {pipeline_mode = #tpu.pipeline_mode<synchronous>, transform_indices = @transform_3, window_bounds = array<i64: 1, 512>}, {transform_indices = @transform_4, window_bounds = array<i64: 1, 1, 512>}]} {
    %c0 = arith.constant 0 : index
    %c0_0 = arith.constant 0 : index
    %c0_1 = arith.constant 0 : index
    %0 = vector.load %arg1[%c0, %c0_0, %c0_1] : memref<1x8x512xf32, #tpu.memory_space<vmem>>, vector<1x8x512xf32>
    %1 = vector.shape_cast %0 : vector<1x8x512xf32> to vector<8x512xf32>
    %2 = arith.truncf %1 : vector<8x512xf32> to vector<8x512xbf16>
    %c0_2 = arith.constant 0 : index
    %c0_3 = arith.constant 0 : index
    %3 = vector.load %arg3[%c0_2, %c0_3] : memref<512x512xbf16, #tpu.memory_space<vmem>>, vector<512x512xbf16>
    %cst = arith.constant dense<0.000000e+00> : vector<8x512xf32>
    %4 = tpu.matmul %2, %3, %cst {dimension_numbers = #tpu.dot_dimension_numbers<[1], [0], [0], [1], [0, 0, 1, 1], [], []>} : vector<8x512xbf16>, vector<512x512xbf16>, vector<8x512xf32> -> vector<8x512xf32>
    %5 = vector.shape_cast %4 : vector<8x512xf32> to vector<1x8x512xf32>
    %c0_4 = arith.constant 0 : index
    %c0_5 = arith.constant 0 : index
    %c0_6 = arith.constant 0 : index
    %6 = vector.load %arg2[%c0_4, %c0_5, %c0_6] : memref<1x1x512xbf16, #tpu.memory_space<vmem>>, vector<1x1x512xbf16>
    %7 = arith.extf %6 : vector<1x1x512xbf16> to vector<1x1x512xf32>
    %8 = vector.broadcast %7 : vector<1x1x512xf32> to vector<1x8x512xf32>
    %9 = arith.addf %5, %8 : vector<1x8x512xf32>
    %10 = math.tanh %9 : vector<1x8x512xf32>
    %cst_7 = arith.constant 0.000000e+00 : f32
    %11 = vector.broadcast %cst_7 : f32 to vector<1x8x512xf32>
    %12 = arith.maximumf %10, %11 : vector<1x8x512xf32>
    %cst_8 = arith.constant 7.500000e-01 : f32
    %13 = vector.broadcast %cst_8 : f32 to vector<1x8x512xf32>
    %14 = arith.mulf %13, %12 : vector<1x8x512xf32>
    %cst_9 = arith.constant 2.500000e-01 : f32
    %15 = vector.broadcast %cst_9 : f32 to vector<1x8x512xf32>
    %16 = arith.mulf %15, %10 : vector<1x8x512xf32>
    %17 = arith.addf %14, %16 : vector<1x8x512xf32>
    %c0_10 = arith.constant 0 : index
    %c0_11 = arith.constant 0 : index
    %18 = vector.load %arg4[%c0_10, %c0_11] : memref<1x512xf32, #tpu.memory_space<vmem>>, vector<1x512xf32>
    %19 = vector.shape_cast %18 : vector<1x512xf32> to vector<1x1x512xf32>
    %20 = vector.broadcast %19 : vector<1x1x512xf32> to vector<1x8x512xf32>
    %21 = arith.mulf %17, %20 : vector<1x8x512xf32>
    %cst_12 = arith.constant dense<0.000000e+00> : vector<1x8xf32>
    %22 = vector.multi_reduction <add>, %21, %cst_12 [2] : vector<1x8x512xf32> to vector<1x8xf32>
    %23 = vector.shape_cast %22 : vector<1x8xf32> to vector<1x8x1xf32>
    %cst_13 = arith.constant dense<0xFF800000> : vector<1x8xf32>
    %24 = vector.multi_reduction <maximumf>, %23, %cst_13 [2] : vector<1x8x1xf32> to vector<1x8xf32>
    %25 = vector.shape_cast %24 : vector<1x8xf32> to vector<1x8x1xf32>
    %26 = arith.subf %23, %25 : vector<1x8x1xf32>
    %27 = math.exp %26 : vector<1x8x1xf32>
    %cst_14 = arith.constant dense<0.000000e+00> : vector<1x8xf32>
    %28 = vector.multi_reduction <add>, %27, %cst_14 [2] : vector<1x8x1xf32> to vector<1x8xf32>
    %29 = vector.shape_cast %28 : vector<1x8xf32> to vector<1x8x1xf32>
    %30 = arith.divf %27, %29 : vector<1x8x1xf32>
    %31 = vector.broadcast %30 : vector<1x8x1xf32> to vector<1x8x512xf32>
    %32 = arith.mulf %31, %0 : vector<1x8x512xf32>
    %cst_15 = arith.constant dense<0.000000e+00> : vector<1x512xf32>
    %33 = vector.multi_reduction <add>, %32, %cst_15 [1] : vector<1x8x512xf32> to vector<1x512xf32>
    %34 = vector.shape_cast %33 : vector<1x512xf32> to vector<1x1x512xf32>
    %c0_16 = arith.constant 0 : index
    %c0_17 = arith.constant 0 : index
    %c0_18 = arith.constant 0 : index
    %35 = vector.load %arg5[%c0_16, %c0_17, %c0_18] : memref<1x1x512xf32, #tpu.memory_space<vmem>>, vector<1x1x512xf32>
    tpu.vector_store %arg5[%c0_16, %c0_17, %c0_18], %34 {strides = array<i32>} : memref<1x1x512xf32, #tpu.memory_space<vmem>>, vector<1x1x512xf32>,
    return
  }
  func.func @transform_0(%arg0: i32) -> (i32, i32, i32) {
    %c0_i32 = arith.constant 0 : i32
    %c0_i32_0 = arith.constant 0 : i32
    %c0_i32_1 = arith.constant 0 : i32
    return %arg0, %c0_i32, %c0_i32_0 : i32, i32, i32
  }
  func.func @transform_1(%arg0: i32) -> (i32, i32, i32) {
    %c0_i32 = arith.constant 0 : i32
    %c0_i32_0 = arith.constant 0 : i32
    %c0_i32_1 = arith.constant 0 : i32
    return %arg0, %c0_i32, %c0_i32_0 : i32, i32, i32
  }
  func.func @transform_2(%arg0: i32) -> (i32, i32) {
    %c0_i32 = arith.constant 0 : i32
    %c0_i32_0 = arith.constant 0 : i32
    %c0_i32_1 = arith.constant 0 : i32
    return %c0_i32, %c0_i32_0 : i32, i32
  }
  func.func @transform_3(%arg0: i32) -> (i32, i32) {
    %c0_i32 = arith.constant 0 : i32
    %c0_i32_0 = arith.constant 0 : i32
    %c0_i32_1 = arith.constant 0 : i32
    return %c0_i32, %c0_i32_0 : i32, i32
  }
  func.func @transform_4(%arg0: i32) -> (i32, i32, i32) {
    %c0_i32 = arith.constant 0 : i32
    %c0_i32_0 = arith.constant 0 : i32
    %c0_i32_1 = arith.constant 0 : i32
    return %arg0, %c0_i32, %c0_i32_0 : i32, i32, i32
  }
}

</mosaic_0001>

<bundles_post_ra>
// kernel: attention_pallas.1
= control target key start
LH: loop header
LB: loop body
LE: loop exit
PB: predicated region body
PF: predicated region fallthrough
CT: control target
= control target key end

     0   :  { %9 = vsyncpa [#allocation3], 0  ;;  %s2407_s0 = inlined_call_operand.vmem [shape: f32[2,8,512], index: 0, kind: input, shape index: {}]   ;;  %s2408_s1 = inlined_call_operand.vmem [shape: bf16[2,1,512], index: 1, kind: input, shape index: {}]   ;;  %s2409_s2 = inlined_call_operand.vmem [shape: bf16[512,512], index: 2, kind: input, shape index: {}]   ;;  %s2410_s3 = inlined_call_operand.vmem [shape: f32[1,512], index: 3, kind: input, shape index: {}]   ;;  %s2411_s4 = inlined_call_operand.hbm [shape: f32[2,1,512], index: 4, kind: output, shape index: {}]  }
   0x1   :  { %11 = vsyncpa [#allocation3 + $0x1], 0  ;;  %s1877_s15 = smov 0   ;;  %s1879_s16 = smov 0  }
   0x2   :  { %s1881_s17 = smov 0   ;;  %s1883_s18 = smov 0  }
   0x3 LB: > { %s1898_s19 = sadd.s32 4294967295, %s1848_s18   ;;  %s1401_s20 = sadd.s32 4294967294, %s1848_s18   ;;  %s1848_s18 = sphi %s1883_s18, %s2417_s18   ;;  %s1844_s17 = sphi %s1881_s17, %s2416_s17   ;;  %s1840_s16 = sphi %s1879_s16, %s2415_s16   ;;  %s1836_s15 = sphi %s1877_s15, %s2414_s15  }
   0x4   : > { %s1902_s21 = sadd.s32 1, %s1848_s18   ;;  %s118_s22 = sadd.s32 1, %s1844_s17 }
   0x5   : > { %s115_s23 = ssub.s32 %s1848_s18, %s1902_s21  ;;  %p128_p0 = scmp.ne.s32.totalorder %s1844_s17, %s1840_s16 }
   0x6   : > { %p116_p1 = scmp.eq.s32.totalorder %s115_s23, 0  ;;  %p129_p2 = scmp.eq.s32.totalorder %s1898_s19, 1 }
   0x7   : > { %p134_p3 = scmp.ne.s32.totalorder %s1840_s16, %s1836_s15  ;;  %p135_p4 = scmp.eq.s32.totalorder %s1401_s20, 1 }
   0x8   : > { %s1913_s24 = scalar_select %p116_p1, %s1844_s17, %s118_s22  }
   0x9   : > { %p1915_p5 = por %p129_p2, %p128_p0  ;;  %p1919_p6 = por %p135_p4, %p134_p3 }
   0xa   : > { %p1404_p7 = scmp.ge.s32.totalorder %s1848_s18, 1  ;;  %p174_p8 = scmp.lt.s32.totalorder %s1848_s18, 3 }
   0xc   : > { %p175_p9 = pnand %p1404_p7, %p174_p8 }
   0xd   : > { %p204_p10 = scmp.lt.s32.totalorder (!%p175_p9), %s1898_s19, 1  ;;  %s201_s8 = sand.u32 (!%p175_p9), 1, %s1840_s16  }
   0xe   : > { %178 = sbr.rel (%p175_p9) target bundleno = 579 (0x243), region = 36  ;;  %s1405_s10 = sshll.u32 (!%p175_p9), %s201_s8, 2 }
   0xf   : > { %s1543_s11 = sshll.u32 (!%p175_p9), %s1898_s19, 6  ;;  %s203_s12 = scalar_lea.vmem (!%p175_p9), [#allocation2], %s1405_s10 }
  0x10   : > { %s1330_s13 = sshll.u32 (!%p175_p9), %s203_s12, 4  ;;  %s1316_s23 = scalar_lea.sflag (!%p175_p9), [#allocation3], %s201_s8  ;;  %s1331_s13 = int_to_ptr.vmem [resolvable:$true] %s1330_s13 }
  0x11   : > { %s1788_s27 = scalar_lea.vmem (!%p175_p9), %s1331_s13, 64  ;;  %s1851_s28 = smov (!%p175_p9), [#allocation2]  }
  0x12   : > { %p1789_p11 = scmp.ne.s32.totalorder (!%p175_p9), %s1331_s13, %s1788_s27 }
  0x13   : > { %v1584_v0 = vld [vmem:[%s2409_s2 + $0xe4] ss:$16 sps:$4 sm:$0xff]   ;;  %v1588_v2 = vld [vmem:[%s2409_s2 + $0xe0] ss:$16 sps:$4 sm:$0xff]   ;;  %s2038_s7 = scalar_select %p204_p10, %s1898_s19, 1 }
  0x14   : > { %v1586_v1 = vld [vmem:[%s2409_s2 + $0x2e4] ss:$16 sps:$4 sm:$0xff]   ;;  %989 = vmatprep.subr.bf16.mxu0 %v1584_v0  ;;  %v1589_v3 = vld [vmem:[%s2409_s2 + $0x2e0] ss:$16 sps:$4 sm:$0xff]   ;;  %p1790_p12 = pnand %p1789_p11, %p1915_p5  ;;  %s1792_s19 = sshll.u32 %s1851_s28, 4  ;;  %s1793_s19 = int_to_ptr.vmem [resolvable:$false] %s1792_s19 }
  0x15   : > { %1030 = vmatprep.subr.bf16.mxu1 %v1586_v1  ;;  %v1590_v4 = vld [vmem:[%s2409_s2 + $0xc4] ss:$16 sps:$4 sm:$0xff]   ;;  %990 = vmatpush1.bf16.msra.mxu0 %v1588_v2  ;;  %v1594_v6 = vld [vmem:[%s2409_s2 + $0xc0] ss:$16 sps:$4 sm:$0xff]   ;;  %s1542_s22 = sshll.u32 %s2038_s7, 5  ;;  %s1408_s29 = sshll.u32 %s2038_s7, 2 }
  0x16   : > { %1031 = vmatpush1.bf16.msra.mxu1 %v1589_v3  ;;  %v1592_v5 = vld [vmem:[%s2409_s2 + $0x2c4] ss:$16 sps:$4 sm:$0xff]   ;;  %991 = vmatprep.subr.bf16.mxu0 %v1590_v4  ;;  %v1595_v7 = vld [vmem:[%s2409_s2 + $0x2c0] ss:$16 sps:$4 sm:$0xff]   ;;  %s2065_s9 = scalar_lea.vmem %s2407_s0, %s1542_s22  ;;  %s212_s6 = scalar_lea.vmem %s2408_s1, %s1408_s29 }
  0x17   : > { %1032 = vmatprep.subr.bf16.mxu1 %v1592_v5  ;;  %v1596_v8 = vld [vmem:[%s2409_s2 + $0xa4] ss:$16 sps:$4 sm:$0xff]   ;;  %v1600_v10 = vld [vmem:[%s2409_s2 + $0xa0] ss:$16 sps:$4 sm:$0xff]   ;;  %v2074_v46 = vld [vmem:[%s2065_s9 + $0x8] sm:$0xff]  ;;  %s1328_s22 = scalar_lea.hbm %s2411_s4, %s1543_s11  ;;  %p1791_p13 = pneg %p1790_p12 }
  0x18   : > { %v1598_v9 = vld [vmem:[%s2409_s2 + $0x2a4] ss:$16 sps:$4 sm:$0xff]   ;;  %v1601_v11 = vld [vmem:[%s2409_s2 + $0x2a0] ss:$16 sps:$4 sm:$0xff]   ;;  %v2081_v48 = vpack.c.bf16 %v2074_v46, %v2074_v46  ;;  %v2084_v49 = vld [vmem:[%s2065_s9 + $0x18] sm:$0xff]  ;;  %s1794_s29 = scalar_lea.vmem %s1793_s19, 128  ;;  %p1795_p0 = scmp.lt.s32.totalorder %s1331_s13, %s1793_s19 }
  0x19   : > { %992 = vmatpush1.bf16.msra.mxu0 %v1594_v6  ;;  %v1602_v12 = vld [vmem:[%s2409_s2 + $0x84] ss:$16 sps:$4 sm:$0xff]   ;;  %v1606_v14 = vld [vmem:[%s2409_s2 + $0x80] ss:$16 sps:$4 sm:$0xff]   ;;  %v220_v51 = vpack.c.bf16 %v2084_v49, %v2084_v49  ;;  %v1682_v6 = vld [vmem:[%s2409_s2 + $0xec] ss:$16 sps:$4 sm:$0xff]   ;;  %p1796_p1 = scmp.lt.s32.totalorder %s1794_s29, %s1788_s27 }
  0x1a   : > { %1033 = vmatpush1.bf16.msra.mxu1 %v1595_v7  ;;  %993 = vmatprep.subr.bf16.mxu0 %v1596_v8  ;;  %v1604_v13 = vld [vmem:[%s2409_s2 + $0x284] ss:$16 sps:$4 sm:$0xff]   ;;  %v1607_v15 = vld [vmem:[%s2409_s2 + $0x280] ss:$16 sps:$4 sm:$0xff]   ;;  %v1685_v7 = vld [vmem:[%s2409_s2 + $0x2ec] ss:$16 sps:$4 sm:$0xff]  }
  0x1b   : > { %1034 = vmatprep.subr.bf16.mxu1 %v1598_v9  ;;  %v1608_v16 = vld [vmem:[%s2409_s2 + $0x64] ss:$16 sps:$4 sm:$0xff]   ;;  %v1612_v18 = vld [vmem:[%s2409_s2 + $0x60] ss:$16 sps:$4 sm:$0xff]   ;;  %1021 = vmatprep.mubr.bf16.mxu0 %v2081_v48  ;;  %p1797_p2 = por %p1796_p1, %p1795_p0 }
  0x1c   : > { %v1610_v17 = vld [vmem:[%s2409_s2 + $0x264] ss:$16 sps:$4 sm:$0xff]   ;;  %v1613_v19 = vld [vmem:[%s2409_s2 + $0x260] ss:$16 sps:$4 sm:$0xff]   ;;  %1062 = vmatprep.mubr.bf16.mxu1 %v220_v51 }
  0x1d   : > { %994 = vmatpush1.bf16.msra.mxu0 %v1600_v10  ;;  %v1614_v20 = vld [vmem:[%s2409_s2 + $0x44] ss:$16 sps:$4 sm:$0xff]   ;;  %v1618_v22 = vld [vmem:[%s2409_s2 + $0x40] ss:$16 sps:$4 sm:$0xff]   ;;  %v1680_v10 = vld [vmem:[%s2409_s2 + $0xe8] ss:$16 sps:$4 sm:$0xff]   ;;  %p1798_p3 = pnand %p1797_p2, %p1791_p13 }
  0x1e   : > { %1035 = vmatpush1.bf16.msra.mxu1 %v1601_v11  ;;  %995 = vmatprep.subr.bf16.mxu0 %v1602_v12  ;;  %v1616_v21 = vld [vmem:[%s2409_s2 + $0x244] ss:$16 sps:$4 sm:$0xff]   ;;  %v1619_v23 = vld [vmem:[%s2409_s2 + $0x240] ss:$16 sps:$4 sm:$0xff]   ;;  %v1683_v11 = vld [vmem:[%s2409_s2 + $0x2e8] ss:$16 sps:$4 sm:$0xff]  }
  0x1f   : > { %1036 = vmatprep.subr.bf16.mxu1 %v1604_v13  ;;  %v1620_v24 = vld [vmem:[%s2409_s2 + $0x24] ss:$16 sps:$4 sm:$0xff]   ;;  %v1624_v26 = vld [vmem:[%s2409_s2 + $0x20] ss:$16 sps:$4 sm:$0xff]   ;;  %v1688_v12 = vld [vmem:[%s2409_s2 + $0xcc] ss:$16 sps:$4 sm:$0xff]  }
  0x20   : > { %v1622_v25 = vld [vmem:[%s2409_s2 + $0x224] ss:$16 sps:$4 sm:$0xff]   ;;  %v1625_v27 = vld [vmem:[%s2409_s2 + $0x220] ss:$16 sps:$4 sm:$0xff]   ;;  %v1691_v13 = vld [vmem:[%s2409_s2 + $0x2cc] ss:$16 sps:$4 sm:$0xff]  }
  0x21   : > { %996 = vmatpush1.bf16.msra.mxu0 %v1606_v14  ;;  %v1626_v28 = vld [vmem:[%s2409_s2 + $0x4] ss:$16 sps:$4 sm:$0xff]   ;;  %v1630_v30 = vld [vmem:[%s2409_s2] ss:$16 sps:$4 sm:$0xff]   ;;  %v1686_v14 = vld [vmem:[%s2409_s2 + $0xc8] ss:$16 sps:$4 sm:$0xff]  }
  0x22   : > { %1037 = vmatpush1.bf16.msra.mxu1 %v1607_v15  ;;  %997 = vmatprep.subr.bf16.mxu0 %v1608_v16  ;;  %v1628_v29 = vld [vmem:[%s2409_s2 + $0x204] ss:$16 sps:$4 sm:$0xff]   ;;  %v1631_v31 = vld [vmem:[%s2409_s2 + $0x200] ss:$16 sps:$4 sm:$0xff]   ;;  %v1689_v15 = vld [vmem:[%s2409_s2 + $0x2c8] ss:$16 sps:$4 sm:$0xff]  }
  0x23   : > { %1038 = vmatprep.subr.bf16.mxu1 %v1610_v17  ;;  %v1632_v32 = vld [vmem:[%s2409_s2 + $0x1e4] ss:$16 sps:$4 sm:$0xff]   ;;  %v1636_v34 = vld [vmem:[%s2409_s2 + $0x1e0] ss:$16 sps:$4 sm:$0xff]   ;;  %v1694_v16 = vld [vmem:[%s2409_s2 + $0xac] ss:$16 sps:$4 sm:$0xff]  }
  0x24   : > { %v1634_v33 = vld [vmem:[%s2409_s2 + $0x3e4] ss:$16 sps:$4 sm:$0xff]   ;;  %v1637_v35 = vld [vmem:[%s2409_s2 + $0x3e0] ss:$16 sps:$4 sm:$0xff]   ;;  %v1697_v17 = vld [vmem:[%s2409_s2 + $0x2ac] ss:$16 sps:$4 sm:$0xff]  }
  0x25   : > { %998 = vmatpush1.bf16.msra.mxu0 %v1612_v18  ;;  %v1638_v36 = vld [vmem:[%s2409_s2 + $0x1c4] ss:$16 sps:$4 sm:$0xff]   ;;  %v1642_v38 = vld [vmem:[%s2409_s2 + $0x1c0] ss:$16 sps:$4 sm:$0xff]   ;;  %v1692_v18 = vld [vmem:[%s2409_s2 + $0xa8] ss:$16 sps:$4 sm:$0xff]  }
  0x26   : > { %1039 = vmatpush1.bf16.msra.mxu1 %v1613_v19  ;;  %999 = vmatprep.subr.bf16.mxu0 %v1614_v20  ;;  %v1640_v37 = vld [vmem:[%s2409_s2 + $0x3c4] ss:$16 sps:$4 sm:$0xff]   ;;  %v1643_v39 = vld [vmem:[%s2409_s2 + $0x3c0] ss:$16 sps:$4 sm:$0xff]   ;;  %v1695_v19 = vld [vmem:[%s2409_s2 + $0x2a8] ss:$16 sps:$4 sm:$0xff]  }
  0x27   : > { %1040 = vmatprep.subr.bf16.mxu1 %v1616_v21  ;;  %v1644_v40 = vld [vmem:[%s2409_s2 + $0x1a4] ss:$16 sps:$4 sm:$0xff]   ;;  %v1648_v42 = vld [vmem:[%s2409_s2 + $0x1a0] ss:$16 sps:$4 sm:$0xff]   ;;  %v1700_v20 = vld [vmem:[%s2409_s2 + $0x8c] ss:$16 sps:$4 sm:$0xff]  }
  0x28   : > { %v1646_v41 = vld [vmem:[%s2409_s2 + $0x3a4] ss:$16 sps:$4 sm:$0xff]   ;;  %v1649_v43 = vld [vmem:[%s2409_s2 + $0x3a0] ss:$16 sps:$4 sm:$0xff]   ;;  %v1703_v21 = vld [vmem:[%s2409_s2 + $0x28c] ss:$16 sps:$4 sm:$0xff]  }
  0x29   : > { %1000 = vmatpush1.bf16.msra.mxu0 %v1618_v22  ;;  %v1650_v44 = vld [vmem:[%s2409_s2 + $0x184] ss:$16 sps:$4 sm:$0xff]   ;;  %v1654_v47 = vld [vmem:[%s2409_s2 + $0x180] ss:$16 sps:$4 sm:$0xff]   ;;  %v1698_v22 = vld [vmem:[%s2409_s2 + $0x88] ss:$16 sps:$4 sm:$0xff]  }
  0x2a   : > { %1041 = vmatpush1.bf16.msra.mxu1 %v1619_v23  ;;  %1001 = vmatprep.subr.bf16.mxu0 %v1620_v24  ;;  %v1652_v45 = vld [vmem:[%s2409_s2 + $0x384] ss:$16 sps:$4 sm:$0xff]   ;;  %v1655_v50 = vld [vmem:[%s2409_s2 + $0x380] ss:$16 sps:$4 sm:$0xff]   ;;  %v1701_v23 = vld [vmem:[%s2409_s2 + $0x288] ss:$16 sps:$4 sm:$0xff]  }
  0x2b   : > { %1042 = vmatprep.subr.bf16.mxu1 %v1622_v25  ;;  %v1656_v52 = vld [vmem:[%s2409_s2 + $0x164] ss:$16 sps:$4 sm:$0xff]   ;;  %v1660_v54 = vld [vmem:[%s2409_s2 + $0x160] ss:$16 sps:$4 sm:$0xff]   ;;  %v1706_v24 = vld [vmem:[%s2409_s2 + $0x6c] ss:$16 sps:$4 sm:$0xff]  }
  0x2c   : > { %v1658_v53 = vld [vmem:[%s2409_s2 + $0x364] ss:$16 sps:$4 sm:$0xff]   ;;  %v1661_v55 = vld [vmem:[%s2409_s2 + $0x360] ss:$16 sps:$4 sm:$0xff]   ;;  %v1709_v25 = vld [vmem:[%s2409_s2 + $0x26c] ss:$16 sps:$4 sm:$0xff]  }
  0x2d   : > { %1002 = vmatpush1.bf16.msra.mxu0 %v1624_v26  ;;  %v1662_v56 = vld [vmem:[%s2409_s2 + $0x144] ss:$16 sps:$4 sm:$0xff]   ;;  %v1666_v58 = vld [vmem:[%s2409_s2 + $0x140] ss:$16 sps:$4 sm:$0xff]   ;;  %v1704_v26 = vld [vmem:[%s2409_s2 + $0x68] ss:$16 sps:$4 sm:$0xff]  }
  0x2e   : > { %1043 = vmatpush1.bf16.msra.mxu1 %v1625_v27  ;;  %1003 = vmatprep.subr.bf16.mxu0 %v1626_v28  ;;  %v1664_v57 = vld [vmem:[%s2409_s2 + $0x344] ss:$16 sps:$4 sm:$0xff]   ;;  %v1667_v59 = vld [vmem:[%s2409_s2 + $0x340] ss:$16 sps:$4 sm:$0xff]   ;;  %v1707_v27 = vld [vmem:[%s2409_s2 + $0x268] ss:$16 sps:$4 sm:$0xff]  }
  0x2f   : > { %1044 = vmatprep.subr.bf16.mxu1 %v1628_v29  ;;  %v1668_v60 = vld [vmem:[%s2409_s2 + $0x124] ss:$16 sps:$4 sm:$0xff]   ;;  %v1672_v62 = vld [vmem:[%s2409_s2 + $0x120] ss:$16 sps:$4 sm:$0xff]   ;;  %v1712_v28 = vld [vmem:[%s2409_s2 + $0x4c] ss:$16 sps:$4 sm:$0xff]  }
  0x30   : > { %v1670_v61 = vld [vmem:[%s2409_s2 + $0x324] ss:$16 sps:$4 sm:$0xff]   ;;  %v1673_v63 = vld [vmem:[%s2409_s2 + $0x320] ss:$16 sps:$4 sm:$0xff]   ;;  %v1715_v29 = vld [vmem:[%s2409_s2 + $0x24c] ss:$16 sps:$4 sm:$0xff]  }
  0x31   : > { %1004 = vmatpush1.bf16.msra.mxu0 %v1630_v30  ;;  %v1674_v0 = vld [vmem:[%s2409_s2 + $0x104] ss:$16 sps:$4 sm:$0xff]   ;;  %v1678_v2 = vld [vmem:[%s2409_s2 + $0x100] ss:$16 sps:$4 sm:$0xff]   ;;  %v1710_v30 = vld [vmem:[%s2409_s2 + $0x48] ss:$16 sps:$4 sm:$0xff]  }
  0x32   : > { %1045 = vmatpush1.bf16.msra.mxu1 %v1631_v31  ;;  %1005 = vmatprep.subr.bf16.mxu0 %v1632_v32  ;;  %v1676_v1 = vld [vmem:[%s2409_s2 + $0x304] ss:$16 sps:$4 sm:$0xff]   ;;  %v1679_v3 = vld [vmem:[%s2409_s2 + $0x300] ss:$16 sps:$4 sm:$0xff]   ;;  %v1713_v31 = vld [vmem:[%s2409_s2 + $0x248] ss:$16 sps:$4 sm:$0xff]  }
  0x33   : > { %1046 = vmatprep.subr.bf16.mxu1 %v1634_v33  ;;  %v2141_v4 = vld [vmem:[%s2065_s9] sm:$0xff]  ;;  %v2144_v5 = vld [vmem:[%s2065_s9 + $0x10] sm:$0xff]  ;;  %v1718_v32 = vld [vmem:[%s2409_s2 + $0x2c] ss:$16 sps:$4 sm:$0xff]  }
  0x34   : > { %v2154_v8 = vpack.c.bf16 %v2141_v4, %v2141_v4  ;;  %v2158_v9 = vpack.c.bf16 %v2144_v5, %v2144_v5  ;;  %v1721_v33 = vld [vmem:[%s2409_s2 + $0x22c] ss:$16 sps:$4 sm:$0xff]  }
  0x35   : > { %1006 = vmatpush2.bf16.msra.mxu0 %v1636_v34  ;;  %v1716_v34 = vld [vmem:[%s2409_s2 + $0x28] ss:$16 sps:$4 sm:$0xff]  }
  0x36   : > { %1047 = vmatpush2.bf16.msra.mxu1 %v1637_v35  ;;  %1007 = vmatprep.subr.bf16.mxu0 %v1638_v36  ;;  %v1719_v35 = vld [vmem:[%s2409_s2 + $0x228] ss:$16 sps:$4 sm:$0xff]   ;;  %v1724_v36 = vld [vmem:[%s2409_s2 + $0xc] ss:$16 sps:$4 sm:$0xff]  }
  0x37   : > { %1048 = vmatprep.subr.bf16.mxu1 %v1640_v37  ;;  %v1727_v37 = vld [vmem:[%s2409_s2 + $0x20c] ss:$16 sps:$4 sm:$0xff]  }
  0x39   : > { %1008 = vmatpush2.bf16.msra.mxu0 %v1642_v38  ;;  %v1722_v38 = vld [vmem:[%s2409_s2 + $0x8] ss:$16 sps:$4 sm:$0xff]  }
  0x3a   : > { %1049 = vmatpush2.bf16.msra.mxu1 %v1643_v39  ;;  %1009 = vmatprep.subr.bf16.mxu0 %v1644_v40  ;;  %v1725_v39 = vld [vmem:[%s2409_s2 + $0x208] ss:$16 sps:$4 sm:$0xff]   ;;  %v1730_v40 = vld [vmem:[%s2409_s2 + $0x1ec] ss:$16 sps:$4 sm:$0xff]  }
  0x3b   : > { %1050 = vmatprep.subr.bf16.mxu1 %v1646_v41  ;;  %v1733_v41 = vld [vmem:[%s2409_s2 + $0x3ec] ss:$16 sps:$4 sm:$0xff]  }
  0x3d   : > { %1010 = vmatpush2.bf16.msra.mxu0 %v1648_v42  ;;  %v1728_v42 = vld [vmem:[%s2409_s2 + $0x1e8] ss:$16 sps:$4 sm:$0xff]  }
  0x3e   : > { %1051 = vmatpush2.bf16.msra.mxu1 %v1649_v43  ;;  %1011 = vmatprep.subr.bf16.mxu0 %v1650_v44  ;;  %v1731_v43 = vld [vmem:[%s2409_s2 + $0x3e8] ss:$16 sps:$4 sm:$0xff]   ;;  %v1736_v44 = vld [vmem:[%s2409_s2 + $0x1cc] ss:$16 sps:$4 sm:$0xff]  }
  0x3f   : > { %1052 = vmatprep.subr.bf16.mxu1 %v1652_v45  ;;  %v1739_v45 = vld [vmem:[%s2409_s2 + $0x3cc] ss:$16 sps:$4 sm:$0xff]  }
  0x41   : > { %1012 = vmatpush2.bf16.msra.mxu0 %v1654_v47  ;;  %v1734_v47 = vld [vmem:[%s2409_s2 + $0x1c8] ss:$16 sps:$4 sm:$0xff]  }
  0x42   : > { %1053 = vmatpush2.bf16.msra.mxu1 %v1655_v50  ;;  %1013 = vmatprep.subr.bf16.mxu0 %v1656_v52  ;;  %v1742_v50 = vld [vmem:[%s2409_s2 + $0x1ac] ss:$16 sps:$4 sm:$0xff]   ;;  %v1740_v52 = vld [vmem:[%s2409_s2 + $0x1a8] ss:$16 sps:$4 sm:$0xff]  }
  0x43   : > { %1054 = vmatprep.subr.bf16.mxu1 %v1658_v53  ;;  %v1743_v53 = vld [vmem:[%s2409_s2 + $0x3a8] ss:$16 sps:$4 sm:$0xff]  }
  0x45   : > { %1014 = vmatpush2.bf16.msra.mxu0 %v1660_v54  ;;  %v1748_v54 = vld [vmem:[%s2409_s2 + $0x18c] ss:$16 sps:$4 sm:$0xff]  }
  0x46   : > { %1055 = vmatpush2.bf16.msra.mxu1 %v1661_v55  ;;  %1015 = vmatprep.subr.bf16.mxu0 %v1662_v56  ;;  %v1751_v55 = vld [vmem:[%s2409_s2 + $0x38c] ss:$16 sps:$4 sm:$0xff]   ;;  %v1746_v56 = vld [vmem:[%s2409_s2 + $0x188] ss:$16 sps:$4 sm:$0xff]  }
  0x47   : > { %1056 = vmatprep.subr.bf16.mxu1 %v1664_v57  ;;  %v1749_v57 = vld [vmem:[%s2409_s2 + $0x388] ss:$16 sps:$4 sm:$0xff]  }
  0x49   : > { %1016 = vmatpush2.bf16.msra.mxu0 %v1666_v58  ;;  %v1754_v58 = vld [vmem:[%s2409_s2 + $0x16c] ss:$16 sps:$4 sm:$0xff]  }
  0x4a   : > { %1057 = vmatpush2.bf16.msra.mxu1 %v1667_v59  ;;  %1017 = vmatprep.subr.bf16.mxu0 %v1668_v60  ;;  %v1757_v59 = vld [vmem:[%s2409_s2 + $0x36c] ss:$16 sps:$4 sm:$0xff]   ;;  %v1752_v60 = vld [vmem:[%s2409_s2 + $0x168] ss:$16 sps:$4 sm:$0xff]  }
  0x4b   : > { %1058 = vmatprep.subr.bf16.mxu1 %v1670_v61  ;;  %v1755_v61 = vld [vmem:[%s2409_s2 + $0x368] ss:$16 sps:$4 sm:$0xff]  }
  0x4d   : > { %1018 = vmatpush2.bf16.msra.mxu0 %v1672_v62  ;;  %v1760_v62 = vld [vmem:[%s2409_s2 + $0x14c] ss:$16 sps:$4 sm:$0xff]  }
  0x4e   : > { %1059 = vmatpush2.bf16.msra.mxu1 %v1673_v63  ;;  %1019 = vmatprep.subr.bf16.mxu0 %v1674_v0  ;;  %v1763_v63 = vld [vmem:[%s2409_s2 + $0x34c] ss:$16 sps:$4 sm:$0xff]   ;;  %v1758_v0 = vld [vmem:[%s2409_s2 + $0x148] ss:$16 sps:$4 sm:$0xff]  }
  0x4f   : > { %1060 = vmatprep.subr.bf16.mxu1 %v1676_v1  ;;  %v1761_v1 = vld [vmem:[%s2409_s2 + $0x348] ss:$16 sps:$4 sm:$0xff]  }
  0x51   : > { %1020 = vmatpush2.bf16.msra.mxu0 %v1678_v2  ;;  %v1766_v2 = vld [vmem:[%s2409_s2 + $0x12c] ss:$16 sps:$4 sm:$0xff]  }
  0x52   : > { %1061 = vmatpush2.bf16.msra.mxu1 %v1679_v3  ;;  %1071 = vmatprep.subr.bf16.mxu0 %v1682_v6  ;;  %v1769_v3 = vld [vmem:[%s2409_s2 + $0x32c] ss:$16 sps:$4 sm:$0xff]   ;;  %v1764_v6 = vld [vmem:[%s2409_s2 + $0x128] ss:$16 sps:$4 sm:$0xff]  }
  0x53   : > { %1112 = vmatprep.subr.bf16.mxu1 %v1685_v7  ;;  %v1767_v7 = vld [vmem:[%s2409_s2 + $0x328] ss:$16 sps:$4 sm:$0xff]  }
  0x54   : > { %1022 = vmatmul.mubr.bf16.vlgmr.msra.gmra.mxu0 %v2154_v8 }
  0x55   : > { %1063 = vmatmul.mubr.bf16.vlgmr.msra.gmra.mxu1 %v2158_v9  ;;  %1072 = vmatpush1.bf16.msra.mxu0 %v1680_v10  ;;  %v1772_v10 = vld [vmem:[%s2409_s2 + $0x10c] ss:$16 sps:$4 sm:$0xff]  }
  0x56   : > { %1113 = vmatpush1.bf16.msra.mxu1 %v1683_v11  ;;  %1073 = vmatprep.subr.bf16.mxu0 %v1688_v12  ;;  %v1775_v11 = vld [vmem:[%s2409_s2 + $0x30c] ss:$16 sps:$4 sm:$0xff]   ;;  %v1770_v12 = vld [vmem:[%s2409_s2 + $0x108] ss:$16 sps:$4 sm:$0xff]  }
  0x57   : > { %1114 = vmatprep.subr.bf16.mxu1 %v1691_v13  ;;  %1103 = vmatprep.mubr.bf16.mxu0 %v2081_v48  ;;  %v1737_v48 = vld [vmem:[%s2409_s2 + $0x3c8] ss:$16 sps:$4 sm:$0xff]  }
  0x58   : > { %1144 = vmatprep.mubr.bf16.mxu1 %v220_v51  ;;  %v1745_v51 = vld [vmem:[%s2409_s2 + $0x3ac] ss:$16 sps:$4 sm:$0xff]   ;;  %v1773_v13 = vld [vmem:[%s2409_s2 + $0x308] ss:$16 sps:$4 sm:$0xff]  }
  0x59   : > { %1074 = vmatpush1.bf16.msra.mxu0 %v1686_v14 }
  0x5a   : > { %1115 = vmatpush1.bf16.msra.mxu1 %v1689_v15  ;;  %1075 = vmatprep.subr.bf16.mxu0 %v1694_v16 }
  0x5b   : > { %1116 = vmatprep.subr.bf16.mxu1 %v1697_v17 }
  0x5d   : > { %1076 = vmatpush1.bf16.msra.mxu0 %v1692_v18 }
  0x5e   : > { %1117 = vmatpush1.bf16.msra.mxu1 %v1695_v19  ;;  %1077 = vmatprep.subr.bf16.mxu0 %v1700_v20 }
  0x5f   : > { %1118 = vmatprep.subr.bf16.mxu1 %v1703_v21 }
  0x61   : > { %1078 = vmatpush1.bf16.msra.mxu0 %v1698_v22  ;;  %v1156_v22 = vlaneseq }
  0x62   : > { %1119 = vmatpush1.bf16.msra.mxu1 %v1701_v23  ;;  %1079 = vmatprep.subr.bf16.mxu0 %v1706_v24 }
  0x63   : > { %1120 = vmatprep.subr.bf16.mxu1 %v1709_v25  ;;  %v2356_v23 = vshrl.u32 %v1156_v22, 7  ;;  %vm1312_vm0 = vcmp.lt.s32.totalorder %v1156_v22, 512 }
  0x65   : > { %1080 = vmatpush1.bf16.msra.mxu0 %v1704_v26  ;;  %v1158_v25 = vsub.s32 0, %v2356_v23 }
  0x66   : > { %1121 = vmatpush1.bf16.msra.mxu1 %v1707_v27  ;;  %1081 = vmatprep.subr.bf16.mxu0 %v1712_v28 }
  0x67   : > { %1122 = vmatprep.subr.bf16.mxu1 %v1715_v29 }
  0x69   : > { %1082 = vmatpush1.bf16.msra.mxu0 %v1710_v30 }
  0x6a   : > { %1123 = vmatpush1.bf16.msra.mxu1 %v1713_v31  ;;  %1083 = vmatprep.subr.bf16.mxu0 %v1718_v32 }
  0x6b   : > { %1124 = vmatprep.subr.bf16.mxu1 %v1721_v33 }
  0x6d   : > { %1084 = vmatpush1.bf16.msra.mxu0 %v1716_v34  ;;  %v1166_v34 = vsub.s32 4, %v2356_v23 }
  0x6e   : > { %1125 = vmatpush1.bf16.msra.mxu1 %v1719_v35  ;;  %1085 = vmatprep.subr.bf16.mxu0 %v1724_v36  ;;  %v1170_v35 = vsub.s32 6, %v2356_v23 }
  0x6f   : > { %1126 = vmatprep.subr.bf16.mxu1 %v1727_v37 }
  0x71   : > { %1086 = vmatpush1.bf16.msra.mxu0 %v1722_v38 }
  0x72   : > { %1127 = vmatpush1.bf16.msra.mxu1 %v1725_v39  ;;  %1087 = vmatprep.subr.bf16.mxu0 %v1730_v40 }
  0x73   : > { %1128 = vmatprep.subr.bf16.mxu1 %v1733_v41 }
  0x75   : > { %1088 = vmatpush2.bf16.msra.mxu0 %v1728_v42 }
  0x76   : > { %1129 = vmatpush2.bf16.msra.mxu1 %v1731_v43  ;;  %1089 = vmatprep.subr.bf16.mxu0 %v1736_v44 }
  0x77   : > { %1130 = vmatprep.subr.bf16.mxu1 %v1739_v45 }
  0x79   : > { %1090 = vmatpush2.bf16.msra.mxu0 %v1734_v47 }
  0x7a   : > { %1131 = vmatpush2.bf16.msra.mxu1 %v1737_v48  ;;  %1091 = vmatprep.subr.bf16.mxu0 %v1742_v50 }
  0x7b   : > { %1132 = vmatprep.subr.bf16.mxu1 %v1745_v51 }
  0x7d   : > { %1092 = vmatpush2.bf16.msra.mxu0 %v1740_v52 }
  0x7e   : > { %1133 = vmatpush2.bf16.msra.mxu1 %v1743_v53  ;;  %1093 = vmatprep.subr.bf16.mxu0 %v1748_v54 }
  0x7f   : > { %1134 = vmatprep.subr.bf16.mxu1 %v1751_v55 }
  0x81   : > { %1094 = vmatpush2.bf16.msra.mxu0 %v1746_v56 }
  0x82   : > { %1135 = vmatpush2.bf16.msra.mxu1 %v1749_v57  ;;  %1095 = vmatprep.subr.bf16.mxu0 %v1754_v58 }
  0x83   : > { %1136 = vmatprep.subr.bf16.mxu1 %v1757_v59  ;;  %v1224_v59 = vsub.s32 1, %v2356_v23 }
  0x85   : > { %1096 = vmatpush2.bf16.msra.mxu0 %v1752_v60 }
  0x86   : > { %1137 = vmatpush2.bf16.msra.mxu1 %v1755_v61  ;;  %1097 = vmatprep.subr.bf16.mxu0 %v1760_v62 }
  0x87   : > { %1138 = vmatprep.subr.bf16.mxu1 %v1763_v63  ;;  %v1216_v63 = vld [vmem:[%s2410_s3] sm:$0xf] }
  0x89   : > { %1098 = vmatpush2.bf16.msra.mxu0 %v1758_v0 }
  0x8a   : > { %1139 = vmatpush2.bf16.msra.mxu1 %v1761_v1  ;;  %1099 = vmatprep.subr.bf16.mxu0 %v1766_v2  ;;  %v1225_v1 = vrot.slane %v1216_v63, %v1224_v59 }
  0x8b   : > { %1140 = vmatprep.subr.bf16.mxu1 %v1769_v3  ;;  %v1232_v3 = vsub.s32 3, %v2356_v23 }
  0x8d   : > { %1100 = vmatpush2.bf16.msra.mxu0 %v1764_v6 }
  0x8e   : > { %1141 = vmatpush2.bf16.msra.mxu1 %v1767_v7  ;;  %1101 = vmatprep.subr.bf16.mxu0 %v1772_v10  ;;  %v1221_v10 = vrot.slane %v1216_v63, %v1158_v25 }
  0x8f   : > { %1142 = vmatprep.subr.bf16.mxu1 %v1775_v11 }
  0x91   : > { %1102 = vmatpush2.bf16.msra.mxu0 %v1770_v12 }
  0x92   : > { %1143 = vmatpush2.bf16.msra.mxu1 %v1773_v13 }
  0x94   : > { %1104 = vmatmul.mubr.bf16.vlgmr.msra.gmra.mxu0 %v2154_v8  ;;  %v1153_v8 = vld [vmem:[%s212_s6] sm:$0xf] }
  0x95   : > { %1145 = vmatmul.mubr.bf16.vlgmr.msra.gmra.mxu1 %v2158_v9  ;;  %v1162_v9 = vsub.s32 2, %v2356_v23  ;;  %v1154_v24 = vunpack.c.l.bf16 %v1153_v8 }
  0x97   : > { %v1163_v26 = vrot.slane %v1154_v24, %v1162_v9  ;;  %v1159_v27 = vrot.slane %v1154_v24, %v1158_v25  ;;  %v1167_v36 = vrot.slane %v1154_v24, %v1166_v34  ;;  %v1171_v37 = vrot.slane %v1154_v24, %v1170_v35 }
  0x98   : > { %v1229_v12 = vrot.slane %v1216_v63, %v1162_v9 }
  0x99   : > { %v1183_v29 = vrot.slane %v1163_v26, %v1158_v25  ;;  %v1179_v31 = vrot.slane %v1159_v27, %v1158_v25  ;;  %v1187_v38 = vrot.slane %v1167_v36, %v1158_v25  ;;  %v1191_v42 = vrot.slane %v1171_v37, %v1158_v25 }
 0x114   : > { %v1023_v14 = vpop.f32.mrf.mxu0 }
 0x115   : > { %v1064_v15 = vpop.f32.mrf.mxu1 }
 0x116   : > { %v1025_v16 = vpop.f32.mrf.mxu0  ;;  %v1065_v30 = vadd.f32 %v1064_v15, %v1023_v14 }
 0x117   : > { %v1066_v17 = vpop.f32.mrf.mxu1 }
 0x118   : > { %v1027_v18 = vpop.f32.mrf.mxu0  ;;  %v1067_v28 = vadd.f32 %v1066_v17, %v1025_v16  ;;  %v1192_v33 = vadd.f32 %v1179_v31, %v1065_v30  ;;  %v1233_v17 = vrot.slane %v1216_v63, %v1232_v3 }
 0x119   : > { %v1068_v19 = vpop.f32.mrf.mxu1 }
 0x11a   : > { %v1028_v20 = vpop.f32.mrf.mxu0  ;;  %v1193_v32 = vadd.f32 %v1183_v29, %v1067_v28 }
 0x11b   : > { %v1069_v21 = vpop.f32.mrf.mxu1 }
 0x11c   : > { %1776 = vtanh.f32 %v1193_v32 }
 0x11d   : > { %1778 = vtanh.f32 %v1192_v33 }
 0x129   : > { %v1777_v52 = vpop.eup %1776 }
 0x12a   : > { %v1779_v55 = vpop.eup %1778  ;;  %v1201_v56 = vmax.f32 %v1777_v52, 0.0  ;;  %v1209_v62 = vmul.f32 0.25, %v1777_v52 }
 0x12b   : > { %v1200_v57 = vmax.f32 %v1779_v55, 0.0  ;;  %v1208_v61 = vmul.f32 0.25, %v1779_v55 }
 0x12c   : > { %v1205_v58 = vmul.f32 0.75, %v1201_v56 }
 0x12d   : > { %v1204_v60 = vmul.f32 0.75, %v1200_v57 }
 0x12e   : > { %v1213_v0 = vadd.f32 %v1209_v62, %v1205_v58 }
 0x12f   : > { %v1212_v7 = vadd.f32 %v1208_v61, %v1204_v60 }
 0x130   : > { %v1239_v16 = vmul.f32 %v1225_v1, %v1213_v0 }
 0x131   : > { %v1238_v21 = vmul.f32 %v1221_v10, %v1212_v7 }
 0x133   : > { %v1242_v26 = vadd.f32 %v1239_v16, %v1238_v21 }
 0x154   : > { %v1105_v39 = vpop.f32.mrf.mxu0 }
 0x155   : > { %v1146_v40 = vpop.f32.mrf.mxu1 }
 0x156   : > { %v1147_v41 = vadd.f32 %v1146_v40, %v1105_v39  ;;  %v1107_v43 = vpop.f32.mrf.mxu0 }
 0x157   : > { %v1148_v44 = vpop.f32.mrf.mxu1 }
 0x158   : > { %v1194_v45 = vadd.f32 %v1187_v38, %v1147_v41  ;;  %v1149_v47 = vadd.f32 %v1148_v44, %v1107_v43  ;;  %v1109_v48 = vpop.f32.mrf.mxu0 }
 0x159   : > { %v1150_v50 = vpop.f32.mrf.mxu1 }
 0x15a   : > { %1780 = vtanh.f32 %v1194_v45  ;;  %v1195_v51 = vadd.f32 %v1191_v42, %v1149_v47  ;;  %v1110_v53 = vpop.f32.mrf.mxu0  ;;  %v1850_v42 = vmov 1966171168  }
 0x15b   : > { %v1151_v54 = vpop.f32.mrf.mxu1  ;;  %v1288_v43 = vunpack.c.l.s4 %v1850_v42 }
 0x15c   : > { %1782 = vtanh.f32 %v1195_v51 }
 0x167   : > { %v1781_v2 = vpop.eup %1780 }
 0x168   : > { %v1202_v6 = vmax.f32 %v1781_v2, 0.0  ;;  %v1210_v15 = vmul.f32 0.25, %v1781_v2 }
 0x169   : > { %v1783_v11 = vpop.eup %1782 }
 0x16a   : > { %v1203_v13 = vmax.f32 %v1783_v11, 0.0  ;;  %v1206_v14 = vmul.f32 0.75, %v1202_v6  ;;  %v1211_v19 = vmul.f32 0.25, %v1783_v11 }
 0x16c   : > { %v1207_v18 = vmul.f32 0.75, %v1203_v13  ;;  %v1214_v20 = vadd.f32 %v1210_v15, %v1206_v14 }
 0x16e   : > { %v1215_v8 = vadd.f32 %v1211_v19, %v1207_v18  ;;  %v1240_v24 = vmul.f32 %v1229_v12, %v1214_v20 }
 0x170   : > { %v1241_v27 = vmul.f32 %v1233_v17, %v1215_v8  ;;  %v1243_v28 = vadd.f32 %v1242_v26, %v1240_v24 }
 0x172   : > { %v1244_v29 = vadd.f32 %v1243_v28, %v1241_v27 }
 0x174   : > { %1245 = vadd.xlane.f32.xlu0 %v1244_v29 }
 0x1fd   : > { %v1246_v30 = vpop.xlane.xlu0 %1245 }
 0x1fe   : > { %v1247_v25 = vsub.f32 %v1246_v30, %v1246_v30 }
 0x200   : > { %v1248_v31 = vmul.f32 1.442695, %v1247_v25 }
 0x202   : > { %1784 = vpow2.f32 %v1248_v31 }
 0x20f   : > { %v1785_v9 = vpop.eup %1784 }
 0x210   : > { %1786 = vrcp.f32 %v1785_v9 }
 0x21d   : > { %v1787_v32 = vpop.eup %1786 }
 0x21e   : > { %v1252_v33 = vmul.f32 %v1787_v32, %v1785_v9 }
 0x220   : > { %v1253_v34 = vmul.f32 %v1252_v33, %v2141_v4  ;;  %v1254_v35 = vmul.f32 %v1252_v33, %v2074_v46  ;;  %v1255_v36 = vmul.f32 %v1252_v33, %v2144_v5  ;;  %v1256_v37 = vmul.f32 %v1252_v33, %v2084_v49 }
 0x221   : > { %v1289_v46 = vunpack.c.0.s8 %v1288_v43 }
 0x222   : > { %v1257_v38 = vrot.slane %v1253_v34, 4  ;;  %v1263_v39 = vrot.slane %v1254_v35, 4  ;;  %v1269_v40 = vrot.slane %v1255_v36, 4  ;;  %v1275_v41 = vrot.slane %v1256_v37, 4 }
 0x223   : > { %v1292_v59 = vsub.s32 %v1289_v46, %v2356_v23 }
 0x224   : > { %v1258_v44 = vadd.f32 %v1257_v38, %v1253_v34  ;;  %v1264_v45 = vadd.f32 %v1263_v39, %v1254_v35  ;;  %v1270_v47 = vadd.f32 %v1269_v40, %v1255_v36  ;;  %v1276_v48 = vadd.f32 %v1275_v41, %v1256_v37 }
 0x226   : > { %v1259_v50 = vrot.slane %v1258_v44, 2  ;;  %v1265_v51 = vrot.slane %v1264_v45, 2  ;;  %v1271_v4 = vrot.slane %v1270_v47, 2  ;;  %v1277_v52 = vrot.slane %v1276_v48, 2 }
 0x228   : > { %v1260_v5 = vadd.f32 %v1259_v50, %v1258_v44  ;;  %v1266_v53 = vadd.f32 %v1265_v51, %v1264_v45  ;;  %v1272_v49 = vadd.f32 %v1271_v4, %v1270_v47  ;;  %v1278_v54 = vadd.f32 %v1277_v52, %v1276_v48 }
 0x22a   : > { %v1261_v55 = vrot.slane %v1260_v5, 1  ;;  %v1267_v56 = vrot.slane %v1266_v53, 1  ;;  %v1273_v57 = vrot.slane %v1272_v49, 1  ;;  %v1279_v58 = vrot.slane %v1278_v54, 1 }
 0x22c   : > { %v1262_v60 = vadd.f32 %v1261_v55, %v1260_v5  ;;  %v1268_v61 = vadd.f32 %v1267_v56, %v1266_v53  ;;  %v1274_v62 = vadd.f32 %v1273_v57, %v1272_v49  ;;  %v1280_v63 = vadd.f32 %v1279_v58, %v1278_v54 }
 0x22e   : > { %v1285_v0 = vcombine.low %v1262_v60, %v1268_v61  ;;  %v1286_v1 = vcombine.low %v1274_v62, %v1280_v63 }
 0x230   : > { %v1293_v2 = vrot.slane %v1285_v0, %v1292_v59  ;;  %v1300_v3 = vrot.slane %v1286_v1, %v1292_v59 }
 0x232   : > { %v1301_v6 = vcombine.low %v1293_v2, %v1300_v3 }
 0x234   : > { %v1308_v7 = vrot.slane %v1301_v6, %v1292_v59 }
 0x236   : > { %1314 = vst.msk [vmem:[%s203_s12] sm:$0xf] %vm1312_vm0, %v1308_v7 }
 0x237   : > { %1801 = shalt.err (!%p1798_p3)
}
 0x238   : > { %s1802_s30 = scalar_lea.hbm %s1328_s22, 64  ;;  %s1806_s7 = scalar_lea.hbm %s2411_s4, 128 }
 0x239   : > { %p1803_p4 = scmp.ne.s32.totalorder %s1328_s22, %s1802_s30  ;;  %p1807_p9 = scmp.lt.s32.totalorder %s1328_s22, %s2411_s4 }
 0x23a   : > { %p1808_p10 = scmp.lt.s32.totalorder %s1806_s7, %s1802_s30 }
 0x23b   : > { %p1804_p7 = pnand %p1803_p4, %p1915_p5 }
 0x23c   : > { %p1809_p11 = por %p1808_p10, %p1807_p9 }
 0x23d   : > { %p1805_p8 = pneg %p1804_p7 }
 0x23f   : > { %p1810_p12 = pnand %p1809_p11, %p1805_p8 }
 0x241   : > { %1813 = shalt.err (!%p1810_p12)
}
 0x242   : > { %1544 = dma.vmem_to_hbm [thread:$0]  (%p1915_p5), %s1331_s13, 64, %s1328_s22, %s1316_s23  }
 0x243 PF: > { %p1550_p13 = scmp.ge.s32.totalorder %s1848_s18, 2  ;;  %s1342_s10 = sand.u32 1, %s1836_s15  }
 0x244   : > { %s1343_s11 = scalar_lea.sflag [#allocation3], %s1342_s10 }
 0x245   : > { %p1547_p0 = pnand %p1550_p13, %p1919_p6 }
 0x247   : > { %p1548_p1 = pneg %p1547_p0 }
 0x249   : > { %1831 = dma.done.wait (%p1548_p1), %s1343_s11, 64  }
 0x24a   : > { %1833 = vsyncadd (%p1548_p1), %s1343_s11, 4294967232  ;;  %p14_p2 = scmp.ge.s32.totalorder %s1902_s21, 4   ;;  %s2414_s15 = smov %s1840_s16 }
 0x24b   : > { %s2415_s16 = smov %s1844_s17  ;;  %s2416_s17 = smov %s1913_s24 }
 0x24c   : > { %s2417_s18 = smov %s1902_s21  ;;  %16 = sbr.rel (!%p14_p2) target bundleno = 3 (0x3), region = 74 }
 0x251   :  { %1348 = vsyncpa [#allocation3], 1 }
 0x252   :  { %1350 = vsyncpa [#allocation3 + $0x1], 1 }

</bundles_post_ra>
